<compile_context>
chip_gen: v7x
topology: tpu7x:2x2x1
jax: 0.10.0
libtpu: 0.0.40
codegen_flags: <defaults>
</compile_context>

<pallas_src>
import functools

import jax
import jax.numpy as jnp
from jax.experimental import pallas as pl
from jax.experimental.pallas import tpu as pltpu


def _round_up(n, m):
    return ((n + m - 1) // m) * m


def _actor_kernel(xin_ref, p_ref, out_ref, *, dim, h1, h2, kin, w_off, b_off):
    """Feature-major (batch-on-lanes) MLP + stochastic sample.

    xin_ref: (kin, tb) input slab, rows:
        0:2*dim      [states_0 ; states_1]^T
        2*dim:3*dim  noise^T  (eps ~ N(0,1))
        3*dim        ones      (layer-1 bias row)
        rest         zeros     (sublane padding)
    p_ref: (rows, cols) param slab, 128-aligned lane segments:
        w_off[0]:+kin  W1^T augmented with b1 in the ones-row column   (h1 rows)
        w_off[1]:+h1   W2^T                                            (h2 rows)
        w_off[2]:+h2   [W_mu ; W_log_std]^T fused head                 (2*dim rows)
        b_off[0]:+1    b2                                              (h2 rows)
        b_off[1]:+1    [b_mu ; b_log_std]                              (2*dim rows)
    out_ref: (dim, tb) — lane-dense samples, transposed back in the wrapper.
    """
    x = xin_ref[...]                                            # (kin, tb)

    w1 = p_ref[0:h1, w_off[0]:w_off[0] + kin]                   # (h1, kin)
    w2 = p_ref[0:h2, w_off[1]:w_off[1] + h1]                    # (h2, h1)
    wh = p_ref[0:2 * dim, w_off[2]:w_off[2] + h2]               # (2*dim, h2)
    b2 = p_ref[0:h2, b_off[0]:b_off[0] + 1]                     # (h2, 1)
    bh = p_ref[0:2 * dim, b_off[1]:b_off[1] + 1]                # (2*dim, 1)

    # layer 1: b1 is folded into w1 via the ones row; noise/pad rows hit zero columns
    h = jnp.maximum(jnp.dot(w1, x, preferred_element_type=jnp.float32), 0.0)
    # layer 2
    h = jnp.maximum(jnp.dot(w2, h, preferred_element_type=jnp.float32) + b2, 0.0)
    # fused heads: rows 0:dim = mean, rows dim:2*dim = log_std
    heads = jnp.dot(wh, h, preferred_element_type=jnp.float32) + bh

    mean = heads[0:dim, :]
    log_std = heads[dim:2 * dim, :]
    eps = x[2 * dim:3 * dim, :]

    # samples = mean + exp(log_std) * eps   (no log_std clamp, matching the module)
    out_ref[...] = mean + jnp.exp(log_std) * eps


def init_params(key, dim, net_arch=(64, 64)):
    """PyTorch-nn.Linear-style uniform init (bound = 1/sqrt(fan_in)).

    Weights stored as (in_features, out_features), biases as (1, out_features).
    """
    input_dim = 2 * dim
    sizes = [(input_dim, net_arch[0]), (net_arch[0], net_arch[1]),
             (net_arch[1], dim), (net_arch[1], dim)]
    params = []
    for (fan_in, fan_out) in sizes:
        key, kw, kb = jax.random.split(key, 3)
        bound = 1.0 / (fan_in ** 0.5)
        w = jax.random.uniform(kw, (fan_in, fan_out), jnp.float32, -bound, bound)
        b = jax.random.uniform(kb, (1, fan_out), jnp.float32, -bound, bound)
        params += [w, b]
    return tuple(params)


def pack_params(params, dim, net_arch=(64, 64)):
    """One-time re-layout into a single transposed, lane-aligned param slab."""
    w1, b1, w2, b2, wmu, bmu, wls, bls = params
    h1, h2 = net_arch
    two_dim = 2 * dim
    kin = _round_up(3 * dim + 1, 8)            # [x0|x1] + noise + ones, sublane-padded
    ones_row = 3 * dim

    # 128-aligned lane segments: W1aug, W2^T, Wh^T, b2, bh
    seg_widths = [kin, h1, h2, 1, 1]
    offs, col = [], 0
    for s in seg_widths:
        offs.append(col)
        col += _round_up(s, 128)
    w_off = (offs[0], offs[1], offs[2])
    b_off = (offs[3], offs[4])

    rows = max(h1, h2, two_dim)
    slab = jnp.zeros((rows, col), jnp.float32)

    # layer-1: transposed weight with b1 folded into the ones-row column;
    # noise / pad columns stay zero so they never contribute to the matmul.
    w1aug = jnp.zeros((h1, kin), jnp.float32)
    w1aug = w1aug.at[:, 0:two_dim].set(w1.T)
    w1aug = w1aug.at[:, ones_row].set(b1[0])
    slab = slab.at[0:h1, w_off[0]:w_off[0] + kin].set(w1aug)

    # layer-2
    slab = slab.at[0:h2, w_off[1]:w_off[1] + h1].set(w2.T)

    # fused heads [mu ; log_std]
    wh = jnp.concatenate([wmu.T, wls.T], axis=0)            # (2*dim, h2)
    slab = slab.at[0:two_dim, w_off[2]:w_off[2] + h2].set(wh)

    # biases as lane-1 columns
    slab = slab.at[0:h2, b_off[0]].set(b2[0])
    bhv = jnp.concatenate([bmu[0], bls[0]], axis=0)          # (2*dim,)
    slab = slab.at[0:two_dim, b_off[1]].set(bhv)

    return dict(slab=slab, dim=dim, h1=h1, h2=h2, kin=kin,
                w_off=w_off, b_off=b_off, ones_row=ones_row)


def stochastic_actor_forward(states_0, states_1, packed, noise, *, block_b=4096):
    """Forward pass (deterministic=False path) of StochasticActor4Layer."""
    B, dim = states_0.shape
    assert dim == packed["dim"]
    kin = packed["kin"]
    slab = packed["slab"]
    assert block_b % 128 == 0

    kernel = functools.partial(
        _actor_kernel, dim=dim, h1=packed["h1"], h2=packed["h2"], kin=kin,
        w_off=packed["w_off"], b_off=packed["b_off"])

    def build_xin(s0, s1, nz):
        b = s0.shape[0]
        parts = [s0.T, s1.T, nz.T, jnp.ones((1, b), jnp.float32)]
        pad_rows = kin - 3 * dim - 1
        if pad_rows:
            parts.append(jnp.zeros((pad_rows, b), jnp.float32))
        return jnp.concatenate(parts, axis=0)                 # (kin, b), lane-dense

    if B <= block_b:
        # Single shot: no grid machinery, both operands pinned in VMEM.
        # (On v7x this uses one TC; batches above block_b take the >=2-step path.)
        vmem = pl.BlockSpec(memory_space=pltpu.MemorySpace.VMEM)
        xin = build_xin(states_0, states_1, noise)
        out_t = pl.pallas_call(
            kernel,
            out_shape=jax.ShapeDtypeStruct((dim, B), jnp.float32),
            in_specs=[vmem, vmem],
            out_specs=vmem,
        )(xin, slab)
        return out_t.T

    # Batch-tiled path: one streamed input slab + one resident param slab.
    # n_steps >= 2 so dimension_semantics=("parallel",) shards the batch across
    # v7x's two TensorCores; tiles are lane-dense so VMEM stays tiny even at tb=4096.
    n_steps = pl.cdiv(B, block_b)
    tb = _round_up(pl.cdiv(B, n_steps), 128)
    bp = n_steps * tb

    pad = bp - B
    if pad:
        z = jnp.zeros((pad, dim), jnp.float32)
        states_0 = jnp.concatenate([states_0, z], axis=0)
        states_1 = jnp.concatenate([states_1, z], axis=0)
        noise = jnp.concatenate([noise, z], axis=0)
    xin = build_xin(states_0, states_1, noise)                # (kin, bp)

    out_t = pl.pallas_call(
        kernel,
        out_shape=jax.ShapeDtypeStruct((dim, bp), jnp.float32),
        grid=(n_steps,),
        in_specs=[pl.BlockSpec((kin, tb), lambda i: (0, i)),
                  pl.BlockSpec(slab.shape, lambda i: (0, 0))],
        out_specs=pl.BlockSpec((dim, tb), lambda i: (0, i)),
        compiler_params=pltpu.CompilerParams(
            dimension_semantics=("parallel",)),
    )(xin, slab)
    return out_t[:, :B].T


def reference_forward(states_0, states_1, params, noise):
    """Pure-JAX reference (mirrors the torch module) for correctness checking."""
    w1, b1, w2, b2, wmu, bmu, wls, bls = params
    x = jnp.concatenate([states_0, states_1], axis=1)
    h1 = jnp.maximum(x @ w1 + b1, 0.0)
    h2 = jnp.maximum(h1 @ w2 + b2, 0.0)
    mean = h2 @ wmu + bmu
    log_std = h2 @ wls + bls
    return mean + jnp.exp(log_std) * noise


if __name__ == "__main__":
    dim = 4
    net_arch = (64, 64)

    key = jax.random.PRNGKey(0)
    kp, k0, k1, kn = jax.random.split(key, 4)

    params = init_params(kp, dim, net_arch)
    packed = pack_params(params, dim, net_arch)

    # --- small batch: grid-less, everything resident in VMEM ---
    batch = 8
    states_0 = jax.random.normal(k0, (batch, dim), jnp.float32)
    states_1 = jax.random.normal(k1, (batch, dim), jnp.float32)
    noise = jax.random.normal(kn, (batch, dim), jnp.float32)   # eps ~ N(0,1), shape (B, dim)

    out = jax.block_until_ready(
        stochastic_actor_forward(states_0, states_1, packed, noise))
    ref = reference_forward(states_0, states_1, params, noise)
    assert out.shape == (batch, dim)
    assert jnp.allclose(out, ref, atol=1e-5, rtol=1e-5), "small-batch mismatch vs reference"

    # --- larger, non-tile-multiple batch: lane-dense tiled grid (>=2 parallel steps) ---
    big = 600
    kb0, kb1, kbn = jax.random.split(jax.random.PRNGKey(1), 3)
    s0b = jax.random.normal(kb0, (big, dim), jnp.float32)
    s1b = jax.random.normal(kb1, (big, dim), jnp.float32)
    nzb = jax.random.normal(kbn, (big, dim), jnp.float32)

    outb = jax.block_until_ready(
        stochastic_actor_forward(s0b, s1b, packed, nzb, block_b=256))
    refb = reference_forward(s0b, s1b, params, nzb)
    assert outb.shape == (big, dim)
    assert jnp.allclose(outb, refb, atol=1e-5, rtol=1e-5), "tiled-batch mismatch vs reference"

    print("KERNEL_OK")
</pallas_src>

<mosaic_0001>
module attributes {stable_mosaic.version = 11 : i64} {
  func.func @_actor_kernel(%arg0: memref<16x8xf32, #tpu.memory_space<vmem>>, %arg1: memref<64x640xf32, #tpu.memory_space<vmem>>, %arg2: memref<4x8xf32, #tpu.memory_space<vmem>>) attributes {dimension_semantics = [], scalar_prefetch = 0 : i64, scratch_operands = 0 : i64, tpu.core_type = #tpu.core_type<tc>} {
    %c0 = arith.constant 0 : index
    %c0_0 = arith.constant 0 : index
    %0 = vector.load %arg0[%c0, %c0_0] : memref<16x8xf32, #tpu.memory_space<vmem>>, vector<16x8xf32>
    %c0_1 = arith.constant 0 : index
    %c0_2 = arith.constant 0 : index
    %1 = vector.load %arg1[%c0_1, %c0_2] : memref<64x640xf32, #tpu.memory_space<vmem>>, vector<64x16xf32>
    %c0_3 = arith.constant 0 : index
    %c128 = arith.constant 128 : index
    %2 = vector.load %arg1[%c0_3, %c128] : memref<64x640xf32, #tpu.memory_space<vmem>>, vector<64x64xf32>
    %c0_4 = arith.constant 0 : index
    %c256 = arith.constant 256 : index
    %3 = vector.load %arg1[%c0_4, %c256] : memref<64x640xf32, #tpu.memory_space<vmem>>, vector<8x64xf32>
    %c0_5 = arith.constant 0 : index
    %c384 = arith.constant 384 : index
    %4 = vector.load %arg1[%c0_5, %c384] : memref<64x640xf32, #tpu.memory_space<vmem>>, vector<64x1xf32>
    %c0_6 = arith.constant 0 : index
    %c512 = arith.constant 512 : index
    %5 = vector.load %arg1[%c0_6, %c512] : memref<64x640xf32, #tpu.memory_space<vmem>>, vector<8x1xf32>
    %cst = arith.constant dense<0.000000e+00> : vector<64x8xf32>
    %6 = tpu.matmul %1, %0, %cst {dimension_numbers = #tpu.dot_dimension_numbers<[1], [0], [0], [1], [0, 0, 1, 1], [], []>} : vector<64x16xf32>, vector<16x8xf32>, vector<64x8xf32> -> vector<64x8xf32>
    %cst_7 = arith.constant 0.000000e+00 : f32
    %7 = vector.broadcast %cst_7 : f32 to vector<64x8xf32>
    %8 = arith.maximumf %6, %7 : vector<64x8xf32>
    %cst_8 = arith.constant dense<0.000000e+00> : vector<64x8xf32>
    %9 = tpu.matmul %2, %8, %cst_8 {dimension_numbers = #tpu.dot_dimension_numbers<[1], [0], [0], [1], [0, 0, 1, 1], [], []>} : vector<64x64xf32>, vector<64x8xf32>, vector<64x8xf32> -> vector<64x8xf32>
    %10 = vector.broadcast %4 : vector<64x1xf32> to vector<64x8xf32>
    %11 = arith.addf %9, %10 : vector<64x8xf32>
    %cst_9 = arith.constant 0.000000e+00 : f32
    %12 = vector.broadcast %cst_9 : f32 to vector<64x8xf32>
    %13 = arith.maximumf %11, %12 : vector<64x8xf32>
    %cst_10 = arith.constant dense<0.000000e+00> : vector<8x8xf32>
    %14 = tpu.matmul %3, %13, %cst_10 {dimension_numbers = #tpu.dot_dimension_numbers<[1], [0], [0], [1], [0, 0, 1, 1], [], []>} : vector<8x64xf32>, vector<64x8xf32>, vector<8x8xf32> -> vector<8x8xf32>
    %15 = vector.broadcast %5 : vector<8x1xf32> to vector<8x8xf32>
    %16 = arith.addf %14, %15 : vector<8x8xf32>
    %17 = vector.extract_strided_slice %16 {offsets = [0, 0], sizes = [4, 8], strides = [1, 1]} : vector<8x8xf32> to vector<4x8xf32>
    %18 = vector.extract_strided_slice %16 {offsets = [4, 0], sizes = [4, 8], strides = [1, 1]} : vector<8x8xf32> to vector<4x8xf32>
    %19 = vector.extract_strided_slice %0 {offsets = [8, 0], sizes = [4, 8], strides = [1, 1]} : vector<16x8xf32> to vector<4x8xf32>
    %20 = math.exp %18 : vector<4x8xf32>
    %21 = arith.mulf %20, %19 : vector<4x8xf32>
    %22 = arith.addf %17, %21 : vector<4x8xf32>
    %c0_11 = arith.constant 0 : index
    %c0_12 = arith.constant 0 : index
    %23 = vector.load %arg2[%c0_11, %c0_12] : memref<4x8xf32, #tpu.memory_space<vmem>>, vector<4x8xf32>
    tpu.vector_store %arg2[%c0_11, %c0_12], %22 {strides = array<i32>} : memref<4x8xf32, #tpu.memory_space<vmem>>, vector<4x8xf32>,
    return
  }
}

</mosaic_0001>

<bundles_post_ra>
// kernel: tpu_custom_call.1
= control target key start
LH: loop header
LB: loop body
LE: loop exit
PB: predicated region body
PF: predicated region fallthrough
CT: control target
= control target key end

     0   :  { %7 = vsyncpa [#allocation3], 0  ;;  %s756_s0 = inlined_call_operand.vmem [shape: f32[16,8], index: 0, kind: input, shape index: {}]   ;;  %s757_s1 = inlined_call_operand.hbm [shape: f32[64,640], index: 1, kind: input, shape index: {}]   ;;  %s758_s2 = inlined_call_operand.hbm [shape: f32[4,8], index: 2, kind: output, shape index: {}]  }
   0x1   :  { %8 = vsyncpa [#allocation4], 0  ;;  %s682_s9 = smov [#allocation2]   ;;  %s634_s13 = scalar_lea.hbm %s757_s1, 5120 }
   0x2   :  { %s16_s10 = sshll.u32 %s682_s9, 4  ;;  %p635_p0 = scmp.ne.s32.totalorder %s757_s1, %s634_s13  ;;  %s17_s10 = int_to_ptr.vmem [resolvable:$true] %s16_s10 }
   0x3   :  { %p638_p1 = scmp.lt.u32.totalorder %s634_s13, %s757_s1 }
   0x5   :  { %p640_p2 = pnand %p638_p1, %p635_p0 }
   0x7   :  { %643 = shalt.err (!%p640_p2)
}
   0x8   :  { %s644_s18 = scalar_lea.vmem %s17_s10, 5120  ;;  %p649_p4 = scmp.lt.s32.totalorder %s17_s10, %s17_s10 }
   0x9   :  { %p645_p3 = scmp.ne.s32.totalorder %s17_s10, %s644_s18  ;;  %p650_p5 = scmp.lt.s32.totalorder %s644_s18, %s644_s18 }
   0xb   :  { %p651_p6 = por %p650_p5, %p649_p4 }
   0xd   :  { %p652_p7 = pnand %p651_p6, %p645_p3 }
   0xf   :  { %655 = shalt.err (!%p652_p7)
}
  0x10   :  { %s683_s19 = smov 640   ;;  %s684_s20 = smov 40  }
  0x11   :  { %22 = dma.hbm_to_vmem [thread:$0]  %s757_s1, 5120, %s17_s10, [#allocation3], %s683_s19, %s683_s19, %s684_s20  }
  0x12   :  { %678 = dma.done.wait [#allocation3], 5120  }
  0x13   :  { %679 = vsyncadd [#allocation3], 4294962176  ;;  %vm54_vm0 = vcmask 130048   ;;  %v26_v0 = vld [vmem:[%s756_s0] sm:$0xff]  ;;  %v723_v1 = vld [vmem:[%s756_s0 + $0x8] sm:$0xff]  ;;  %vm232_vm1 = vcmask 523264  }
  0x14   :  { %v28_v2 = vld [vmem:[#allocation2] sm:$0xff]  ;;  %v590_v3 = vpack.c.bf16 %v723_v1, %v26_v0  ;;  %v29_v4 = vld [vmem:[#allocation2 + $0x28] sm:$0xff]  ;;  %v30_v5 = vld [vmem:[#allocation2 + $0x50] sm:$0xff]  ;;  %v685_v14 = vmov 0   ;;  %v686_v49 = vmov 0.0|0.0   ;;  %vm687_vm2 = vmmov 0  }
  0x15   :  { %531 = vmatprep.mubr.msk.f32.mxu0 %vm54_vm0, %v28_v2  ;;  %v31_v6 = vld [vmem:[#allocation2 + $0x78] sm:$0xff]  ;;  %v32_v7 = vld [vmem:[#allocation2 + $0xa0] sm:$0xff]  ;;  %v33_v8 = vld [vmem:[#allocation2 + $0xc8] sm:$0xff]  ;;  %630 = vset.pattern.permute.xlu0 %v685_v14  ;;  %v688_v50 = vmov 0.0   ;;  %s689_s0 = smov [#allocation5]   ;;  %vm458_vm3 = vcmask 60416  }
  0x16   :  { %591 = vmatprep.subr.bf16.mxu0 %v590_v3  ;;  %v34_v9 = vld [vmem:[#allocation2 + $0xf0] sm:$0xff]  ;;  %v35_v10 = vld [vmem:[#allocation2 + $0x118] sm:$0xff]  ;;  %v36_v11 = vld [vmem:[#allocation2 + $0x8] sm:$0xff]  ;;  %631 = vset.pattern.permute.xlu1 %v685_v14  ;;  %s466_s1 = sshll.u32 %s689_s0, 4  ;;  %s467_s1 = int_to_ptr.vmem [resolvable:$true] %s466_s1 }
  0x17   :  { %593 = vmatpush3.bf16.msra.mxu0 %v590_v3  ;;  %559 = vmatprep.mubr.msk.f32.mxu1 %vm232_vm1, %v36_v11  ;;  %v45_v12 = vld [vmem:[#allocation2 + $0x18] sm:$0xff]  ;;  %v47_v13 = vld [vmem:[#allocation2 + $0x68] sm:$0xff]  ;;  %v46_v15 = vld [vmem:[#allocation2 + $0x40] sm:$0xff]  ;;  %s656_s27 = scalar_lea.vmem %s467_s1, 64  ;;  %p661_p9 = scmp.lt.s32.totalorder %s467_s1, %s467_s1 }
  0x18   :  { %194 = vperm.xlu0 %630, %v45_v12   ;;  %204 = vperm.xlu1 %631, %v47_v13   ;;  %v48_v16 = vld [vmem:[#allocation2 + $0x90] sm:$0xff]  ;;  %v49_v17 = vld [vmem:[#allocation2 + $0xb8] sm:$0xff]  ;;  %v50_v18 = vld [vmem:[#allocation2 + $0xe0] sm:$0xff]  ;;  %p657_p8 = scmp.ne.s32.totalorder %s467_s1, %s656_s27  ;;  %p662_p10 = scmp.lt.s32.totalorder %s656_s27, %s656_s27 }
  0x19   :  { %v51_v19 = vld [vmem:[#allocation2 + $0x108] sm:$0xff]  ;;  %v52_v20 = vld [vmem:[#allocation2 + $0x130] sm:$0xff]  ;;  %v53_v21 = vld [vmem:[#allocation2 + $0x20] sm:$0xff]  ;;  %610 = vmatprep.subr.bf16.mxu0 %v686_v49 }
  0x1a   :  { %532 = vmatmul.mubr.msk.f32.vlgmr.msra.gmra.mrb[0].mxu0 %vm54_vm0, %v29_v4  ;;  %v37_v42 = vld [vmem:[#allocation2 + $0x30] sm:$0xff]  ;;  %v38_v43 = vld [vmem:[#allocation2 + $0x58] sm:$0xff]  ;;  %v39_v44 = vld [vmem:[#allocation2 + $0x80] sm:$0xff]  ;;  %p663_p11 = por %p662_p10, %p661_p9 }
  0x1b   :  { %534 = vmatprep.mubr.msk.f32.mxu0 %vm54_vm0, %v30_v5  ;;  %v40_v45 = vld [vmem:[#allocation2 + $0xa8] sm:$0xff]  ;;  %v41_v46 = vld [vmem:[#allocation2 + $0xd0] sm:$0xff]  ;;  %v42_v47 = vld [vmem:[#allocation2 + $0xf8] sm:$0xff] }
  0x1c   :  { %199 = vperm.xlu0 %630, %v46_v15   ;;  %209 = vperm.xlu1 %631, %v48_v16   ;;  %v43_v48 = vld [vmem:[#allocation2 + $0x120] sm:$0xff]  ;;  %p664_p12 = pnand %p663_p11, %p657_p8 }
  0x1e   :  { %535 = vmatmul.mubr.msk.f32.gmra.mrb[2].mxu0 %vm54_vm0, %v31_v6 }
  0x1f   :  { %537 = vmatprep.mubr.msk.f32.mxu0 %vm54_vm0, %v32_v7 }
  0x20   :  { %214 = vperm.xlu0 %630, %v49_v17   ;;  %219 = vperm.xlu1 %631, %v50_v18  }
  0x22   :  { %538 = vmatmul.mubr.msk.f32.gmra.mrb[4].mxu0 %vm54_vm0, %v33_v8 }
  0x23   :  { %540 = vmatprep.mubr.msk.f32.mxu0 %vm54_vm0, %v34_v9 }
  0x24   :  { %224 = vperm.xlu0 %630, %v51_v19   ;;  %229 = vperm.xlu1 %631, %v52_v20  }
  0x26   :  { %541 = vmatmul.mubr.msk.f32.gmra.mrb[6].mxu0 %vm54_vm0, %v35_v10 }
  0x27   :  { %587 = vmatprep.mubr.msk.f32.mxu0 %vm687_vm2, %v688_v50 }
  0x28   :  { %372 = vperm.xlu0 %630, %v53_v21  }
  0x97   :  { %v195_v51 = vpop.permute.xlu0 %194  ;;  %v205_v52 = vpop.permute.xlu1 %204 }
  0x9b   :  { %v200_v53 = vpop.permute.xlu0 %199  ;;  %v210_v54 = vpop.permute.xlu1 %209 }
  0x9f   :  { %v220_v0 = vpop.permute.xlu1 %219  ;;  %v215_v4 = vpop.permute.xlu0 %214 }
  0xa3   :  { %v230_v13 = vpop.permute.xlu1 %229  ;;  %v225_v16 = vpop.permute.xlu0 %224 }
  0xed   :  { %v533_v22 = vpop.f32.mrb[0].mxu0 }
  0xee   :  { %v185_v23 = vmax.f32 %v533_v22, 0.0  ;;  %v145_v24 = vpop.f32.mrb[1].mxu0 }
  0xef   :  { %v184_v25 = vmax.f32 %v145_v24, 0.0  ;;  %v44_v24 = vld [vmem:[#allocation2 + $0x10] sm:$0xff] }
  0xf1   :  { %v536_v26 = vpop.f32.mrb[2].mxu0  ;;  %v594_v27 = vpack.c.bf16 %v185_v23, %v184_v25  ;;  %v373_v25 = vpop.permute.xlu0 %372 }
  0xf2   :  { %v187_v28 = vmax.f32 %v536_v26, 0.0  ;;  %v155_v29 = vpop.f32.mrb[3].mxu0 }
  0xf3   :  { %v186_v30 = vmax.f32 %v155_v29, 0.0  ;;  %595 = vmatprep.subr.bf16.mxu1 %v594_v27 }
  0xf4   :  { %597 = vmatpush3.bf16.msra.mxu1 %v594_v27 }
  0xf5   :  { %v598_v31 = vpack.c.bf16 %v187_v28, %v186_v30  ;;  %v539_v32 = vpop.f32.mrb[4].mxu0  ;;  %v451_v30 = vrot.slane %v723_v1, 4 }
  0xf6   :  { %v189_v33 = vmax.f32 %v539_v32, 0.0  ;;  %v165_v34 = vpop.f32.mrb[5].mxu0 }
  0xf7   :  { %v188_v35 = vmax.f32 %v165_v34, 0.0  ;;  %599 = vmatprep.subr.bf16.mxu1 %v598_v31 }
  0xf8   :  { %601 = vmatpush3.bf16.msra.mxu1 %v598_v31 }
  0xf9   :  { %v602_v36 = vpack.c.bf16 %v189_v33, %v188_v35  ;;  %v542_v37 = vpop.f32.mrb[6].mxu0 }
  0xfa   :  { %v191_v38 = vmax.f32 %v542_v37, 0.0  ;;  %v175_v39 = vpop.f32.mrb[7].mxu0 }
  0xfb   :  { %v190_v40 = vmax.f32 %v175_v39, 0.0  ;;  %603 = vmatprep.subr.bf16.mxu1 %v602_v36 }
  0xfc   :  { %605 = vmatpush3.bf16.msra.mxu1 %v602_v36 }
  0xfd   :  { %v606_v41 = vpack.c.bf16 %v191_v38, %v190_v40 }
  0xff   :  { %607 = vmatprep.subr.bf16.mxu1 %v606_v41 }
 0x100   :  { %609 = vmatpush3.bf16.msra.mxu1 %v606_v41 }
 0x103   :  { %560 = vmatmul.mubr.msk.f32.vlgmr.msra.gmra.mrb[0].mxu1 %vm232_vm1, %v37_v42 }
 0x104   :  { %562 = vmatprep.mubr.msk.f32.mxu1 %vm232_vm1, %v38_v43 }
 0x107   :  { %563 = vmatmul.mubr.msk.f32.gmra.mrb[2].mxu1 %vm232_vm1, %v39_v44 }
 0x108   :  { %565 = vmatprep.mubr.msk.f32.mxu1 %vm232_vm1, %v40_v45 }
 0x10b   :  { %566 = vmatmul.mubr.msk.f32.gmra.mrb[4].mxu1 %vm232_vm1, %v41_v46 }
 0x10c   :  { %568 = vmatprep.mubr.msk.f32.mxu1 %vm232_vm1, %v42_v47 }
 0x10f   :  { %569 = vmatmul.mubr.msk.f32.gmra.mrb[6].mxu1 %vm232_vm1, %v43_v48 }
 0x1d6   :  { %v561_v55 = vpop.f32.mrb[0].mxu1 }
 0x1d7   :  { %v329_v56 = vadd.f32 %v561_v55, %v200_v53  ;;  %v323_v57 = vpop.f32.mrb[1].mxu1 }
 0x1d8   :  { %v324_v58 = vadd.f32 %v323_v57, %v195_v51 }
 0x1d9   :  { %v363_v59 = vmax.f32 %v329_v56, 0.0 }
 0x1da   :  { %v362_v60 = vmax.f32 %v324_v58, 0.0  ;;  %v564_v61 = vpop.f32.mrb[2].mxu1 }
 0x1db   :  { %v339_v62 = vadd.f32 %v564_v61, %v210_v54  ;;  %v333_v63 = vpop.f32.mrb[3].mxu1 }
 0x1dc   :  { %v611_v2 = vpack.c.bf16 %v363_v59, %v362_v60  ;;  %v334_v3 = vadd.f32 %v333_v63, %v205_v52 }
 0x1dd   :  { %v365_v5 = vmax.f32 %v339_v62, 0.0 }
 0x1de   :  { %v364_v6 = vmax.f32 %v334_v3, 0.0  ;;  %v567_v7 = vpop.f32.mrb[4].mxu1  ;;  %612 = vmatpush3.bf16.msra.mxu0 %v611_v2 }
 0x1df   :  { %v349_v8 = vadd.f32 %v567_v7, %v220_v0  ;;  %v343_v9 = vpop.f32.mrb[5].mxu1  ;;  %613 = vmatprep.subr.bf16.mxu0 %v686_v49 }
 0x1e0   :  { %v614_v10 = vpack.c.bf16 %v365_v5, %v364_v6  ;;  %v344_v11 = vadd.f32 %v343_v9, %v215_v4 }
 0x1e1   :  { %v367_v12 = vmax.f32 %v349_v8, 0.0 }
 0x1e2   :  { %v366_v14 = vmax.f32 %v344_v11, 0.0  ;;  %v570_v15 = vpop.f32.mrb[6].mxu1  ;;  %615 = vmatpush3.bf16.msra.mxu0 %v614_v10 }
 0x1e3   :  { %v359_v17 = vadd.f32 %v570_v15, %v230_v13  ;;  %v353_v18 = vpop.f32.mrb[7].mxu1  ;;  %616 = vmatprep.subr.bf16.mxu0 %v686_v49 }
 0x1e4   :  { %v617_v19 = vpack.c.bf16 %v367_v12, %v366_v14  ;;  %v354_v20 = vadd.f32 %v353_v18, %v225_v16 }
 0x1e5   :  { %v369_v21 = vmax.f32 %v359_v17, 0.0 }
 0x1e6   :  { %v368_v22 = vmax.f32 %v354_v20, 0.0  ;;  %618 = vmatpush3.bf16.msra.mxu0 %v617_v19 }
 0x1e7   :  { %619 = vmatprep.subr.bf16.mxu0 %v686_v49 }
 0x1e8   :  { %v620_v23 = vpack.c.bf16 %v369_v21, %v368_v22 }
 0x1ea   :  { %621 = vmatpush3.bf16.msra.mxu0 %v620_v23 }
 0x1ed   :  { %588 = vmatmul.mubr.msk.f32.vlgmr.msra.gmra.mrb[8].mxu0 %vm232_vm1, %v44_v24 }
 0x2c0   :  { %v444_v26 = vpop.f32.mrb[8].mxu0 }
 0x2c1   :  { %v445_v27 = vadd.f32 %v444_v26, %v373_v25  ;;  %v589_v28 = vpop.f32.mrb[9].mxu0 }
 0x2c3   :  { %v448_v29 = vmul.f32 1.442695, %v445_v27 }
 0x2c5   :  { %632 = vpow2.f32 %v448_v29 }
 0x2cf   :  { %v633_v31 = vpop.eup %632 }
 0x2d0   :  { %v453_v32 = vmul.f32 %v633_v31, %v451_v30 }
 0x2d2   :  { %v455_v33 = vrot.slane %v453_v32, 4 }
 0x2d4   :  { %v457_v34 = vadd.f32 %v455_v33, %v445_v27 }
 0x2d6   :  { %459 = vst.msk [vmem:[#allocation5] sm:$0xf] %vm458_vm3, %v457_v34 }
 0x2d7   :  { %667 = shalt.err (!%p664_p12)
}
 0x2d8   :  { %s668_s30 = scalar_lea.hbm %s758_s2, 64 }
 0x2d9   :  { %p669_p13 = scmp.ne.s32.totalorder %s758_s2, %s668_s30  ;;  %p672_p0 = scmp.lt.u32.totalorder %s668_s30, %s758_s2 }
 0x2db   :  { %p674_p1 = pnand %p672_p0, %p669_p13 }
 0x2dd   :  { %677 = shalt.err (!%p674_p1)
}
 0x2de   :  { %469 = dma.vmem_to_hbm [thread:$0]  %s467_s1, 64, %s758_s2, [#allocation4]  }
 0x2df   :  { %680 = dma.done.wait [#allocation4], 64  }
 0x2e0   :  { %681 = vsyncadd [#allocation4], 4294967232 }
 0x2e1   :  { %473 = vsyncpa [#allocation3], 1 }
 0x2e2   :  { %474 = vsyncpa [#allocation4], 1 }

</bundles_post_ra>
